<compile_context>
chip_gen: v5e
topology: v5e:2x2
jax: 0.10.0
libtpu: 0.0.40
codegen_flags: <defaults>
</compile_context>

<pallas_src>
import numpy as np

import jax
import jax.numpy as jnp
from jax.experimental import pallas as pl
from jax.experimental.pallas import tpu as pltpu


def _make_kernel(mxu_dtype):
    def kernel(b2_ref,                       # SMEM scalar prefetch: (1,) f32
               hs_ref,                       # (1, TS, H)  input dtype
               q_row_ref,                    # (1, 1, H)
               q_col_ref,                    # (1, H, 1)
               pm_ref,                       # (1, TS, 1)  f32
               wh_ref, wq_ref, wx_ref,       # (H, H)      mxu_dtype
               b1_ref,                       # (1, H)      f32
               w2_ref,                       # (1, H)      f32
               out_ref,                      # (1, TS, 1)  out dtype
               w_eff_ref,                    # VMEM scratch (H, H) mxu_dtype
               rbias_ref):                   # VMEM scratch (1, H) f32
        # ---- per-batch-element setup: runs only on the first seq tile ----
        @pl.when(pl.program_id(1) == 0)
        def _():
            q_col = q_col_ref[0].astype(jnp.float32)           # (H, 1)
            w_eff = (wh_ref[...].astype(jnp.float32)
                     + q_col * wx_ref[...].astype(jnp.float32))  # fold in f32
            w_eff_ref[...] = w_eff.astype(w_eff_ref.dtype)
            q_row = q_row_ref[0].astype(mxu_dtype)             # (1, H)
            rbias_ref[...] = (
                jnp.dot(q_row, wq_ref[...],
                        preferred_element_type=jnp.float32)    # rank-1 term
                + b1_ref[...])

        # ---- per seq-tile work: single (TS,H) x (H,H) matmul ----
        hs = hs_ref[0].astype(mxu_dtype)                        # (TS, H)
        x = (jnp.dot(hs, w_eff_ref[...],
                     preferred_element_type=jnp.float32)
             + rbias_ref[...])                                  # (TS, H) f32
        x = jnp.maximum(x, 0.0)                                 # ReLU

        # dense Linear(H -> 1) on VPU + lane reduce (skip N=1 MXU matmul)
        logits = (jnp.sum(x * w2_ref[...], axis=-1, keepdims=True)
                  + b2_ref[0])                                  # (TS, 1)

        # p_mask handling (fp32 path of the reference)
        p = pm_ref[0]                                           # (TS, 1) f32
        logits = logits * p - 1e30 * (1.0 - p)
        out_ref[0] = logits.astype(out_ref.dtype)

    return kernel


def _pick_seq_tile(S):
    for ts in (512, 256, 128, 64, 32, 16, 8):
        if S % ts == 0:
            return ts
    return S


def pooler_start_logits(hidden_states, question_emb, w1, b1, w2, b2,
                        p_mask=None, *, mxu_dtype=None, seq_tile=None):
    B, S, H = hidden_states.shape
    assert question_emb.shape == (B, H)
    assert w1.shape == (3 * H, H) and b1.shape == (H,)
    assert w2.shape == (H, 1) and b2.shape == (1,)

    out_dtype = hidden_states.dtype
    if mxu_dtype is None:
        # Default: bf16 MXU only if the activations already are bf16; otherwise
        # keep the exact f32 path. Pass mxu_dtype=jnp.bfloat16 explicitly for
        # the fast v6e/v7x path (f32 accumulation is kept either way).
        mxu_dtype = (jnp.bfloat16 if hidden_states.dtype == jnp.bfloat16
                     else jnp.float32)
    ts = seq_tile if seq_tile is not None else _pick_seq_tile(S)
    assert S % ts == 0, "seq_tile must divide S"

    # Split W1 into its three (H,H) sub-blocks in the wrapper (zero-cost slices
    # of the parameter) so the kernel never materializes a (3H,H) value.
    w_h = w1[0:H, :].astype(mxu_dtype)
    w_q = w1[H:2 * H, :].astype(mxu_dtype)
    w_x = w1[2 * H:3 * H, :].astype(mxu_dtype)
    b1_row = b1.reshape(1, H).astype(jnp.float32)
    w2_row = w2.reshape(1, H).astype(jnp.float32)     # (H,1) -> (1,H) row
    b2_s = b2.reshape(1).astype(jnp.float32)          # -> SMEM scalar prefetch

    # q in both orientations (row for the rank-1 bias matmul, column for the
    # per-row weight rescale) to avoid an in-kernel transpose.
    q_row = question_emb.reshape(B, 1, H)
    q_col = question_emb.reshape(B, H, 1)

    if p_mask is None:
        pm3 = jnp.ones((B, S, 1), dtype=jnp.float32)
    else:
        pm3 = p_mask.astype(jnp.float32).reshape(B, S, 1)

    mxu_bytes = np.dtype(mxu_dtype).itemsize
    hs_bytes = hidden_states.size * np.dtype(hidden_states.dtype).itemsize
    bytes_accessed = int(
        hs_bytes
        + 3 * H * H * mxu_bytes                                  # W_h/W_q/W_x
        + 2 * B * H * np.dtype(question_emb.dtype).itemsize      # q row+col
        + B * S * 4                                              # p_mask
        + B * S * np.dtype(out_dtype).itemsize                   # output
        + (2 * H + 1) * 4)                                       # b1, w2, b2
    flops = int(2 * B * S * H * H        # hs @ w_eff (the only big matmul)
                + 2 * B * S * H          # H -> 1 contraction
                + 3 * B * H * H          # per-batch fold + rank-1 bias matmul
                + 4 * B * S)             # mask arithmetic

    out = pl.pallas_call(
        _make_kernel(mxu_dtype),
        out_shape=jax.ShapeDtypeStruct((B, S, 1), out_dtype),
        grid_spec=pltpu.PrefetchScalarGridSpec(
            num_scalar_prefetch=1,        # b2 lands in SMEM
            grid=(B, S // ts),
            in_specs=[
                pl.BlockSpec((1, ts, H), lambda b, s, *_: (b, s, 0)),  # hs
                pl.BlockSpec((1, 1, H), lambda b, s, *_: (b, 0, 0)),   # q row
                pl.BlockSpec((1, H, 1), lambda b, s, *_: (b, 0, 0)),   # q col
                pl.BlockSpec((1, ts, 1), lambda b, s, *_: (b, s, 0)),  # p_mask
                pl.BlockSpec((H, H), lambda b, s, *_: (0, 0)),         # W_h
                pl.BlockSpec((H, H), lambda b, s, *_: (0, 0)),         # W_q
                pl.BlockSpec((H, H), lambda b, s, *_: (0, 0)),         # W_x
                pl.BlockSpec((1, H), lambda b, s, *_: (0, 0)),         # b1
                pl.BlockSpec((1, H), lambda b, s, *_: (0, 0)),         # w2
            ],
            out_specs=pl.BlockSpec((1, ts, 1), lambda b, s, *_: (b, s, 0)),
            scratch_shapes=[
                pltpu.VMEM((H, H), mxu_dtype),     # per-batch folded weight
                pltpu.VMEM((1, H), jnp.float32),   # per-batch row bias
            ]),
        compiler_params=pltpu.CompilerParams(
            # S axis is "arbitrary": the s==0 tile writes the per-batch scratch
            # that later S tiles of the same batch consume.
            dimension_semantics=("parallel", "arbitrary")),
        cost_estimate=pl.CostEstimate(
            flops=flops, transcendentals=0, bytes_accessed=bytes_accessed),
    )(b2_s, hidden_states, q_row, q_col, pm3, w_h, w_q, w_x, b1_row, w2_row)

    return out[..., 0]                   # (B, S) -- the .squeeze(-1)


def _reference(hidden_states, question_emb, w1, b1, w2, b2, p_mask):
    # plain-JAX reference of the PyTorch forward, for a sanity check
    q = jnp.broadcast_to(question_emb[:, None, :], hidden_states.shape)
    cat = jnp.concatenate([hidden_states, q, hidden_states * q], axis=-1)
    x = jnp.maximum(cat @ w1 + b1, 0.0)
    logits = (x @ w2 + b2)[..., 0]
    return logits * p_mask - 1e30 * (1.0 - p_mask)


if __name__ == "__main__":
    B, S, H = 2, 8, 32
    key = jax.random.PRNGKey(0)
    k_hs, k_q, k_w1, k_b1, k_w2, k_b2, k_m = jax.random.split(key, 7)

    hidden_states = jax.random.normal(k_hs, (B, S, H), dtype=jnp.float32)
    question_emb = jax.random.normal(k_q, (B, H), dtype=jnp.float32)

    # Deterministic synthetic parameters (nn.Linear(3H, H), nn.Linear(H, 1))
    w1 = (jax.random.normal(k_w1, (3 * H, H), dtype=jnp.float32)
          / jnp.sqrt(3.0 * H))
    b1 = jax.random.normal(k_b1, (H,), dtype=jnp.float32) * 0.01
    w2 = jax.random.normal(k_w2, (H, 1), dtype=jnp.float32) / jnp.sqrt(1.0 * H)
    b2 = jax.random.normal(k_b2, (1,), dtype=jnp.float32) * 0.01

    p_mask = (jax.random.uniform(k_m, (B, S)) > 0.3).astype(jnp.float32)

    ref = _reference(hidden_states, question_emb, w1, b1, w2, b2, p_mask)

    # Exact-precision path (f32 MXU operands): tight tolerance vs. reference.
    out_f32 = pooler_start_logits(hidden_states, question_emb, w1, b1, w2, b2,
                                  p_mask=p_mask, mxu_dtype=jnp.float32)
    out_f32 = jax.block_until_ready(out_f32)
    assert out_f32.shape == (B, S)
    assert jnp.allclose(out_f32, ref, rtol=1e-4, atol=1e-4), \
        "f32-path mismatch vs reference"

    # Fast path (bf16 MXU operands, f32 accumulate) — recommended on v6e/v7x;
    # matmul precision changes, so compare with a looser tolerance.
    out_bf16 = pooler_start_logits(hidden_states, question_emb, w1, b1, w2, b2,
                                   p_mask=p_mask, mxu_dtype=jnp.bfloat16)
    out_bf16 = jax.block_until_ready(out_bf16)
    assert out_bf16.shape == (B, S)
    assert jnp.allclose(out_bf16, ref, rtol=1e-1, atol=1e-1), \
        "bf16-path mismatch vs reference"

    print("KERNEL_OK")
</pallas_src>

<mosaic_0001>
module attributes {stable_mosaic.version = 11 : i64} {
  func.func @kernel(%arg0: i32, %arg1: i32, %arg2: memref<1xf32, #tpu.memory_space<smem>>, %arg3: memref<1x8x32xf32, #tpu.memory_space<vmem>>, %arg4: memref<1x1x32xf32, #tpu.memory_space<vmem>>, %arg5: memref<1x32x1xf32, #tpu.memory_space<vmem>>, %arg6: memref<1x8x1xf32, #tpu.memory_space<vmem>>, %arg7: memref<32x32xf32, #tpu.memory_space<vmem>>, %arg8: memref<32x32xf32, #tpu.memory_space<vmem>>, %arg9: memref<32x32xf32, #tpu.memory_space<vmem>>, %arg10: memref<1x32xf32, #tpu.memory_space<vmem>>, %arg11: memref<1x32xf32, #tpu.memory_space<vmem>>, %arg12: memref<1x8x1xf32, #tpu.memory_space<vmem>>, %arg13: memref<32x32xf32, #tpu.memory_space<vmem>>, %arg14: memref<1x32xf32, #tpu.memory_space<vmem>>) attributes {dimension_semantics = [#tpu.dimension_semantics<parallel>, #tpu.dimension_semantics<arbitrary>], iteration_bounds = array<i64: 2, 1>, scalar_prefetch = 1 : i64, scratch_operands = 2 : i64, tpu.core_type = #tpu.core_type<tc>, window_params = [{transform_indices = @transform_0, window_bounds = array<i64: 1, 8, 32>}, {transform_indices = @transform_1, window_bounds = array<i64: 1, 1, 32>}, {transform_indices = @transform_2, window_bounds = array<i64: 1, 32, 1>}, {transform_indices = @transform_3, window_bounds = array<i64: 1, 8, 1>}, {pipeline_mode = #tpu.pipeline_mode<synchronous>, transform_indices = @transform_4, window_bounds = array<i64: 32, 32>}, {pipeline_mode = #tpu.pipeline_mode<synchronous>, transform_indices = @transform_5, window_bounds = array<i64: 32, 32>}, {pipeline_mode = #tpu.pipeline_mode<synchronous>, transform_indices = @transform_6, window_bounds = array<i64: 32, 32>}, {pipeline_mode = #tpu.pipeline_mode<synchronous>, transform_indices = @transform_7, window_bounds = array<i64: 1, 32>}, {pipeline_mode = #tpu.pipeline_mode<synchronous>, transform_indices = @transform_8, window_bounds = array<i64: 1, 32>}, {transform_indices = @transform_9, window_bounds = array<i64: 1, 8, 1>}]} {
    %c0_i32 = arith.constant 0 : i32
    %0 = arith.cmpi eq, %arg1, %c0_i32 : i32
    %1 = arith.extui %0 : i1 to i32
    %c0_i32_0 = arith.constant 0 : i32
    %2 = arith.cmpi ne, %1, %c0_i32_0 : i32
    scf.if %2 {
      %c0_20 = arith.constant 0 : index
      %c0_21 = arith.constant 0 : index
      %c0_22 = arith.constant 0 : index
      %31 = vector.load %arg5[%c0_20, %c0_21, %c0_22] : memref<1x32x1xf32, #tpu.memory_space<vmem>>, vector<1x32x1xf32>
      %32 = vector.shape_cast %31 : vector<1x32x1xf32> to vector<32x1xf32>
      %c0_23 = arith.constant 0 : index
      %c0_24 = arith.constant 0 : index
      %33 = vector.load %arg7[%c0_23, %c0_24] : memref<32x32xf32, #tpu.memory_space<vmem>>, vector<32x32xf32>
      %c0_25 = arith.constant 0 : index
      %c0_26 = arith.constant 0 : index
      %34 = vector.load %arg9[%c0_25, %c0_26] : memref<32x32xf32, #tpu.memory_space<vmem>>, vector<32x32xf32>
      %35 = vector.broadcast %32 : vector<32x1xf32> to vector<32x32xf32>
      %36 = arith.mulf %35, %34 : vector<32x32xf32>
      %37 = arith.addf %33, %36 : vector<32x32xf32>
      %c0_27 = arith.constant 0 : index
      %c0_28 = arith.constant 0 : index
      %38 = vector.load %arg13[%c0_27, %c0_28] : memref<32x32xf32, #tpu.memory_space<vmem>>, vector<32x32xf32>
      tpu.vector_store %arg13[%c0_27, %c0_28], %37 {strides = array<i32>} : memref<32x32xf32, #tpu.memory_space<vmem>>, vector<32x32xf32>,
      %c0_29 = arith.constant 0 : index
      %c0_30 = arith.constant 0 : index
      %c0_31 = arith.constant 0 : index
      %39 = vector.load %arg4[%c0_29, %c0_30, %c0_31] : memref<1x1x32xf32, #tpu.memory_space<vmem>>, vector<1x1x32xf32>
      %40 = vector.shape_cast %39 : vector<1x1x32xf32> to vector<1x32xf32>
      %c0_32 = arith.constant 0 : index
      %c0_33 = arith.constant 0 : index
      %41 = vector.load %arg8[%c0_32, %c0_33] : memref<32x32xf32, #tpu.memory_space<vmem>>, vector<32x32xf32>
      %cst_34 = arith.constant dense<0.000000e+00> : vector<1x32xf32>
      %42 = tpu.matmul %40, %41, %cst_34 {dimension_numbers = #tpu.dot_dimension_numbers<[1], [0], [0], [1], [0, 0, 1, 1], [], []>} : vector<1x32xf32>, vector<32x32xf32>, vector<1x32xf32> -> vector<1x32xf32>
      %c0_35 = arith.constant 0 : index
      %c0_36 = arith.constant 0 : index
      %43 = vector.load %arg10[%c0_35, %c0_36] : memref<1x32xf32, #tpu.memory_space<vmem>>, vector<1x32xf32>
      %44 = arith.addf %42, %43 : vector<1x32xf32>
      %c0_37 = arith.constant 0 : index
      %c0_38 = arith.constant 0 : index
      %45 = vector.load %arg14[%c0_37, %c0_38] : memref<1x32xf32, #tpu.memory_space<vmem>>, vector<1x32xf32>
      tpu.vector_store %arg14[%c0_37, %c0_38], %44 {strides = array<i32>} : memref<1x32xf32, #tpu.memory_space<vmem>>, vector<1x32xf32>,
    } else {
    }
    %c0 = arith.constant 0 : index
    %c0_1 = arith.constant 0 : index
    %c0_2 = arith.constant 0 : index
    %3 = vector.load %arg3[%c0, %c0_1, %c0_2] : memref<1x8x32xf32, #tpu.memory_space<vmem>>, vector<1x8x32xf32>
    %4 = vector.shape_cast %3 : vector<1x8x32xf32> to vector<8x32xf32>
    %c0_3 = arith.constant 0 : index
    %c0_4 = arith.constant 0 : index
    %5 = vector.load %arg13[%c0_3, %c0_4] : memref<32x32xf32, #tpu.memory_space<vmem>>, vector<32x32xf32>
    %cst = arith.constant dense<0.000000e+00> : vector<8x32xf32>
    %6 = tpu.matmul %4, %5, %cst {dimension_numbers = #tpu.dot_dimension_numbers<[1], [0], [0], [1], [0, 0, 1, 1], [], []>} : vector<8x32xf32>, vector<32x32xf32>, vector<8x32xf32> -> vector<8x32xf32>
    %c0_5 = arith.constant 0 : index
    %c0_6 = arith.constant 0 : index
    %7 = vector.load %arg14[%c0_5, %c0_6] : memref<1x32xf32, #tpu.memory_space<vmem>>, vector<1x32xf32>
    %8 = vector.broadcast %7 : vector<1x32xf32> to vector<8x32xf32>
    %9 = arith.addf %6, %8 : vector<8x32xf32>
    %cst_7 = arith.constant 0.000000e+00 : f32
    %10 = vector.broadcast %cst_7 : f32 to vector<8x32xf32>
    %11 = arith.maximumf %9, %10 : vector<8x32xf32>
    %c0_8 = arith.constant 0 : index
    %c0_9 = arith.constant 0 : index
    %12 = vector.load %arg11[%c0_8, %c0_9] : memref<1x32xf32, #tpu.memory_space<vmem>>, vector<1x32xf32>
    %13 = vector.broadcast %12 : vector<1x32xf32> to vector<8x32xf32>
    %14 = arith.mulf %11, %13 : vector<8x32xf32>
    %cst_10 = arith.constant dense<0.000000e+00> : vector<8xf32>
    %15 = vector.multi_reduction <add>, %14, %cst_10 [1] : vector<8x32xf32> to vector<8xf32>
    %16 = vector.shape_cast %15 : vector<8xf32> to vector<8x1xf32>
    %c0_11 = arith.constant 0 : index
    %17 = memref.load %arg2[%c0_11] : memref<1xf32, #tpu.memory_space<smem>>
    %18 = vector.broadcast %17 : f32 to vector<8x1xf32>
    %19 = arith.addf %16, %18 : vector<8x1xf32>
    %c0_12 = arith.constant 0 : index
    %c0_13 = arith.constant 0 : index
    %c0_14 = arith.constant 0 : index
    %20 = vector.load %arg6[%c0_12, %c0_13, %c0_14] : memref<1x8x1xf32, #tpu.memory_space<vmem>>, vector<1x8x1xf32>
    %21 = vector.shape_cast %20 : vector<1x8x1xf32> to vector<8x1xf32>
    %22 = arith.mulf %19, %21 : vector<8x1xf32>
    %cst_15 = arith.constant 1.000000e+00 : f32
    %23 = vector.broadcast %cst_15 : f32 to vector<8x1xf32>
    %24 = arith.subf %23, %21 : vector<8x1xf32>
    %cst_16 = arith.constant 1.000000e+30 : f32
    %25 = vector.broadcast %cst_16 : f32 to vector<8x1xf32>
    %26 = arith.mulf %25, %24 : vector<8x1xf32>
    %27 = arith.subf %22, %26 : vector<8x1xf32>
    %c0_17 = arith.constant 0 : index
    %c0_18 = arith.constant 0 : index
    %c0_19 = arith.constant 0 : index
    %28 = vector.load %arg12[%c0_17, %c0_18, %c0_19] : memref<1x8x1xf32, #tpu.memory_space<vmem>>, vector<1x8x1xf32>
    %29 = vector.shape_cast %28 : vector<1x8x1xf32> to vector<8x1xf32>
    %30 = vector.shape_cast %27 : vector<8x1xf32> to vector<1x8x1xf32>
    tpu.vector_store %arg12[%c0_17, %c0_18, %c0_19], %30 {strides = array<i32>} : memref<1x8x1xf32, #tpu.memory_space<vmem>>, vector<1x8x1xf32>,
    return
  }
  func.func @transform_0(%arg0: i32, %arg1: i32, %arg2: memref<1xf32, #tpu.memory_space<smem>>) -> (i32, i32, i32) {
    %c0_i32 = arith.constant 0 : i32
    %c0_i32_0 = arith.constant 0 : i32
    return %arg0, %arg1, %c0_i32 : i32, i32, i32
  }
  func.func @transform_1(%arg0: i32, %arg1: i32, %arg2: memref<1xf32, #tpu.memory_space<smem>>) -> (i32, i32, i32) {
    %c0_i32 = arith.constant 0 : i32
    %c0_i32_0 = arith.constant 0 : i32
    %c0_i32_1 = arith.constant 0 : i32
    return %arg0, %c0_i32, %c0_i32_0 : i32, i32, i32
  }
  func.func @transform_2(%arg0: i32, %arg1: i32, %arg2: memref<1xf32, #tpu.memory_space<smem>>) -> (i32, i32, i32) {
    %c0_i32 = arith.constant 0 : i32
    %c0_i32_0 = arith.constant 0 : i32
    %c0_i32_1 = arith.constant 0 : i32
    return %arg0, %c0_i32, %c0_i32_0 : i32, i32, i32
  }
  func.func @transform_3(%arg0: i32, %arg1: i32, %arg2: memref<1xf32, #tpu.memory_space<smem>>) -> (i32, i32, i32) {
    %c0_i32 = arith.constant 0 : i32
    %c0_i32_0 = arith.constant 0 : i32
    return %arg0, %arg1, %c0_i32 : i32, i32, i32
  }
  func.func @transform_4(%arg0: i32, %arg1: i32, %arg2: memref<1xf32, #tpu.memory_space<smem>>) -> (i32, i32) {
    %c0_i32 = arith.constant 0 : i32
    %c0_i32_0 = arith.constant 0 : i32
    %c0_i32_1 = arith.constant 0 : i32
    return %c0_i32, %c0_i32_0 : i32, i32
  }
  func.func @transform_5(%arg0: i32, %arg1: i32, %arg2: memref<1xf32, #tpu.memory_space<smem>>) -> (i32, i32) {
    %c0_i32 = arith.constant 0 : i32
    %c0_i32_0 = arith.constant 0 : i32
    %c0_i32_1 = arith.constant 0 : i32
    return %c0_i32, %c0_i32_0 : i32, i32
  }
  func.func @transform_6(%arg0: i32, %arg1: i32, %arg2: memref<1xf32, #tpu.memory_space<smem>>) -> (i32, i32) {
    %c0_i32 = arith.constant 0 : i32
    %c0_i32_0 = arith.constant 0 : i32
    %c0_i32_1 = arith.constant 0 : i32
    return %c0_i32, %c0_i32_0 : i32, i32
  }
  func.func @transform_7(%arg0: i32, %arg1: i32, %arg2: memref<1xf32, #tpu.memory_space<smem>>) -> (i32, i32) {
    %c0_i32 = arith.constant 0 : i32
    %c0_i32_0 = arith.constant 0 : i32
    %c0_i32_1 = arith.constant 0 : i32
    return %c0_i32, %c0_i32_0 : i32, i32
  }
  func.func @transform_8(%arg0: i32, %arg1: i32, %arg2: memref<1xf32, #tpu.memory_space<smem>>) -> (i32, i32) {
    %c0_i32 = arith.constant 0 : i32
    %c0_i32_0 = arith.constant 0 : i32
    %c0_i32_1 = arith.constant 0 : i32
    return %c0_i32, %c0_i32_0 : i32, i32
  }
  func.func @transform_9(%arg0: i32, %arg1: i32, %arg2: memref<1xf32, #tpu.memory_space<smem>>) -> (i32, i32, i32) {
    %c0_i32 = arith.constant 0 : i32
    %c0_i32_0 = arith.constant 0 : i32
    return %arg0, %arg1, %c0_i32 : i32, i32, i32
  }
}

</mosaic_0001>

<bundles_post_ra>
// kernel: tpu_custom_call.1
= control target key start
LH: loop header
LB: loop body
LE: loop exit
PB: predicated region body
PF: predicated region fallthrough
CT: control target
= control target key end

     0   :  { %s967_s0 = inlined_call_operand.<no memory space> [shape: f32[1], index: 0, kind: input, shape index: {}]   ;;  %s968_s1 = inlined_call_operand.vmem [shape: f32[2,8,32], index: 1, kind: input, shape index: {}]   ;;  %s969_s2 = inlined_call_operand.vmem [shape: f32[2,1,32], index: 2, kind: input, shape index: {}]   ;;  %s970_s3 = inlined_call_operand.vmem [shape: f32[2,32,1], index: 3, kind: input, shape index: {}]   ;;  %s971_s4 = inlined_call_operand.vmem [shape: f32[2,8,1], index: 4, kind: input, shape index: {}]   ;;  %s972_s5 = inlined_call_operand.vmem [shape: f32[32,32], index: 5, kind: input, shape index: {}]   ;;  %s973_s6 = inlined_call_operand.vmem [shape: f32[32,32], index: 6, kind: input, shape index: {}]   ;;  %s974_s7 = inlined_call_operand.hbm [shape: f32[32,32], index: 7, kind: input, shape index: {}]   ;;  %s975_s8 = inlined_call_operand.vmem [shape: f32[1,32], index: 8, kind: input, shape index: {}]   ;;  %s976_s9 = inlined_call_operand.vmem [shape: f32[1,32], index: 9, kind: input, shape index: {}]   ;;  %s977_s10 = inlined_call_operand.vmem [shape: f32[2,8,1], index: 10, kind: output, shape index: {}]  }
   0x1   :  { %15 = sst [smem:[#allocation5]] %s967_s0 }
   0x2   :  { %16 = vsyncpa [#allocation7], 0  ;;  %s874_s15 = smov 0   ;;  %s876_s16 = smov 0  }
   0x3   :  { %s878_s17 = smov 0  }
   0x4 LB: > { %s695_s0 = sadd.s32 4294967295, %s810_s17   ;;  %s34_s18 = sadd.s32 1, %s806_s16  ;;  %s810_s17 = sphi %s878_s17, %s22_s17   ;;  %s806_s16 = sphi %s876_s16, %s979_s16   ;;  %s802_s15 = sphi %s874_s15, %s978_s15  }
   0x5   : > { %p36_p0 = scmp.ge.s32.totalorder %s34_s18, 2  ;;  %p697_p1 = scmp.ge.s32.totalorder %s810_s17, 1 }
   0x6   : > { %p280_p2 = scmp.lt.s32.totalorder %s810_s17, 3  ;;  %p720_p4 = scmp.eq.s32.totalorder %s695_s0, 0 }
   0x7   : > { %s981_s18 = smov (%p36_p0, %s34_s18), 0  ;;  %s297_s21 = sshll.u32 %s974_s7, 4  ;;  %s298_s21 = int_to_ptr.hbm [resolvable:$true] %s297_s21 }
   0x8   : > { %p281_p3 = pnand %p697_p1, %p280_p2  ;;  %s812_s22 = smov [#allocation6]  }
   0x9   : > { %s299_s23 = sshll.u32 %s812_s22, 4  ;;  %s813_s24 = smov 128   ;;  %s300_s23 = int_to_ptr.vmem [resolvable:$true] %s299_s23 }
   0xa   : > { %p716_p5 = pneg %p281_p3  ;;  %s814_s25 = smov 8  }
   0xb   : > { %355 = sbr.rel (%p281_p3) target bundleno = 419 (0x1a3), region = 56 }
   0xc   : > { %p717_p6 = pnand %p720_p4, %p716_p5 }
   0xe   : > { %719 = dma.hbm_to_vmem [thread:$0]  (!%p717_p6), %s298_s21, 512, %s300_s23, [#allocation7], %s813_s24, %s813_s24, %s814_s25  }
  0x10   : > { %797 = dma.done.wait (%p720_p4), [#allocation7], 512  }
  0x11   : > { %799 = vsyncadd (%p720_p4), [#allocation7], 4294966784  ;;  %p411_p7 = scmp.lt.s32.totalorder %s802_s15, 1  ;;  %v815_v0 = vmov 0   ;;  %v493_v5 = vld [vmem:[%s973_s6 + $0x18] sm:$0xff]  ;;  %v492_v6 = vld [vmem:[%s973_s6 + $0x10] sm:$0xff] }
  0x12   : > { %751 = vset.pattern.permute.xlu1 %v815_v0  ;;  %750 = vset.pattern.permute.xlu0 %v815_v0  ;;  %v491_v7 = vld [vmem:[%s973_s6 + $0x8] sm:$0xff]  ;;  %v490_v8 = vld [vmem:[%s973_s6] sm:$0xff]  ;;  %vm484_vm0 = vcmask 261120   ;;  %v451_v12 = vld [vmem:[%s972_s5 + $0x18] sm:$0xff]  ;;  %vm518_vm1 = vcmask 253952   ;;  %s562_s22 = sld [smem:[#allocation5]] }
  0x13   : > { %s983_s15 = smov (!%p411_p7, %s802_s15), 1  ;;  %510 = vmatpush.msra.mxu0 %v493_v5  ;;  %v455_v10 = vld [vmem:[#allocation6 + $0x18] sm:$0xff]  ;;  %v453_v11 = vld [vmem:[#allocation6 + $0x8] sm:$0xff]  ;;  %v454_v20 = vld [vmem:[#allocation6 + $0x10] sm:$0xff]  ;;  %vm570_vm2 = vcmask 7168  }
  0x14   : > { %s711_s26 = sshll.u32 %s983_s15, 5  ;;  %s420_s19 = scalar_lea.vmem %s969_s2, %s983_s15  ;;  %v449_v14 = vld [vmem:[%s972_s5 + $0x8] sm:$0xff]  ;;  %v450_v22 = vld [vmem:[%s972_s5 + $0x10] sm:$0xff]  ;;  %v448_v24 = vld [vmem:[%s972_s5] sm:$0xff] }
  0x15   : > { %s425_s29 = scalar_lea.vmem %s970_s3, %s711_s26  ;;  %511 = vmatpush.msra.mxu0 %v492_v6  ;;  %v489_v9 = vld [vmem:[%s420_s19] sm:$0x1]  ;;  %v452_v21 = vld [vmem:[#allocation6] sm:$0xff]  ;;  %s936_s12 = sshll.u32 %s983_s15, 3 }
  0x16   : > { %v447_v1 = vld [vmem:[%s425_s29 + $0x18] sm:$0xff]  ;;  %v445_v2 = vld [vmem:[%s425_s29 + $0x8] sm:$0xff]  ;;  %v446_v3 = vld [vmem:[%s425_s29 + $0x10] sm:$0xff]  ;;  %s417_s0 = scalar_lea.vmem %s968_s1, %s936_s12  ;;  %s432_s25 = scalar_lea.vmem %s971_s4, %s936_s12 }
  0x17   : > { %473 = vperm.xlu0 %750, %v447_v1   ;;  %463 = vperm.xlu1 %751, %v445_v2   ;;  %v444_v4 = vld [vmem:[%s425_s29] sm:$0xff]  ;;  %s439_s28 = scalar_lea.vmem %s977_s10, %s936_s12 }
  0x18   : > { %512 = vmatpush.msra.mxu0 %v491_v7  ;;  %v520_v33 = vld [vmem:[%s417_s0] sm:$0xff]  ;;  %v563_v47 = vstv %s562_s22 }
  0x19   : > { %v494_v35 = vld [vmem:[%s975_s8] sm:$0x1] }
  0x1a   : > { %513 = vmatpush.msra.mxu0 %v490_v8  ;;  %v753_v41 = vld [vmem:[%s976_s9] ss:$0 sm:$0xff] }
  0x1b   : > { %707 = vmatmul.msk.f32.vlgmr.msra.gmra.mxu0 %vm484_vm0, %v489_v9  ;;  %v565_v45 = vld [vmem:[%s432_s25] sm:$0xff] }
  0x1c   : > { %v567_v46 = vsub.f32 1.0, %v565_v45 }
  0x1e   : > { %v568_v49 = vmul.f32 1e+30, %v567_v46 }
  0x1f   : > { %468 = vperm.xlu0 %750, %v446_v3   ;;  %458 = vperm.xlu1 %751, %v444_v4  }
  0x89   : > { %v474_v13 = vpop.permute.xlu0 %473  ;;  %v464_v15 = vpop.permute.xlu1 %463 }
  0x8a   : > { %v479_v16 = vmul.f32 %v474_v13, %v455_v10  ;;  %v477_v17 = vmul.f32 %v464_v15, %v453_v11 }
  0x8c   : > { %v483_v18 = vadd.f32 %v479_v16, %v451_v12  ;;  %v481_v19 = vadd.f32 %v477_v17, %v449_v14 }
  0x8e   : > { %488 = vst.msk [vmem:[#allocation2 + $0x18] sm:$0xff] %vm484_vm0, %v483_v18 }
  0x8f   : > { %486 = vst.msk [vmem:[#allocation2 + $0x8] sm:$0xff] %vm484_vm0, %v481_v19 }
  0x91   : > { %v469_v23 = vpop.permute.xlu0 %468  ;;  %v459_v25 = vpop.permute.xlu1 %458 }
  0x92   : > { %v478_v26 = vmul.f32 %v469_v23, %v454_v20  ;;  %v476_v27 = vmul.f32 %v459_v25, %v452_v21 }
  0x94   : > { %v482_v28 = vadd.f32 %v478_v26, %v450_v22  ;;  %v480_v29 = vadd.f32 %v476_v27, %v448_v24 }
  0x95   : > { %v524_v30 = vld [vmem:[#allocation2 + $0x18] sm:$0xff] }
  0x96   : > { %487 = vst.msk [vmem:[#allocation2 + $0x10] sm:$0xff] %vm484_vm0, %v482_v28  ;;  %545 = vmatpush.msra.mxu1 %v524_v30  ;;  %v522_v32 = vld [vmem:[#allocation2 + $0x8] sm:$0xff] }
  0x97   : > { %485 = vst.msk [vmem:[#allocation2] sm:$0xff] %vm484_vm0, %v480_v29 }
  0x98   : > { %v515_v36 = vpop.f32.mrf.mxu0 }
  0x99   : > { %v516_v37 = vadd.f32 %v515_v36, %v494_v35 }
  0x9b   : > { %519 = vst.msk [vmem:[#allocation3] sm:$0x1] %vm518_vm1, %v516_v37 }
  0x9d   : > { %v523_v31 = vld [vmem:[#allocation2 + $0x10] sm:$0xff] }
  0x9e   : > { %546 = vmatpush.msra.mxu1 %v523_v31  ;;  %v521_v34 = vld [vmem:[#allocation2] sm:$0xff] }
  0xa0   : > { %547 = vmatpush.msra.mxu1 %v522_v32 }
  0xa2   : > { %548 = vmatpush.msra.mxu1 %v521_v34  ;;  %v752_v38 = vld [vmem:[#allocation3] ss:$0 sm:$0xff] }
  0xa3   : > { %708 = vmatmul.msk.f32.vlgmr.msra.gmra.mxu1 %vm484_vm0, %v520_v33 }
 0x120   : > { %v550_v39 = vpop.f32.mrf.mxu1 }
 0x121   : > { %v551_v40 = vadd.f32 %v752_v38, %v550_v39 }
 0x123   : > { %v553_v42 = vmax.f32 %v551_v40, 0.0 }
 0x125   : > { %v558_v43 = vmul.f32 %v753_v41, %v553_v42 }
 0x127   : > { %v559_v44 = vsel %vm484_vm0, %v558_v43, 0.0 }
 0x128   : > { %560 = vadd.xlane.f32.xlu2 %v559_v44 }
 0x19b   : > { %v561_v48 = vpop.xlane.xlu2 %560 }
 0x19c   : > { %v564_v50 = vadd.f32 %v563_v47, %v561_v48 }
 0x19e   : > { %v566_v51 = vmul.f32 %v565_v45, %v564_v50 }
 0x1a0   : > { %v569_v52 = vsub.f32 %v566_v51, %v568_v49 }
 0x1a2   : > { %571 = vst.msk [vmem:[%s439_s28] sm:$0xff] %vm570_vm2, %v569_v52 }
 0x1a3 PF: > { %s22_s17 = sadd.s32 1, %s810_s17   ;;  %s978_s15 = smov %s806_s16 }
 0x1a4   : > { %p19_p8 = scmp.ge.s32.totalorder %s22_s17, 4   ;;  %s979_s16 = smov %s981_s18 }
 0x1a6   :  { %21 = sbr.rel (!%p19_p8) target bundleno = 4 (0x4), region = 104 }
 0x1ab   :  { %597 = vsyncpa [#allocation7], 1 }
 0x1ac   :  { %599 = vsyncpa [#allocation7 + $0x1], 1 }

</bundles_post_ra>
